<compile_context>
chip_gen: v6e
topology: v6e:2x2x1
jax: 0.10.0
libtpu: 0.0.40
codegen_flags: <defaults>
</compile_context>

<pallas_src>
import functools
import math

import jax
import jax.numpy as jnp
from jax.experimental import pallas as pl
from jax.experimental.pallas import tpu as pltpu

# The PyTorch module hard-codes d_k = d_v = 64 and always divides scores by
# sqrt(d_k) == 8 regardless of the tensor's actual head dim; we mirror that.
D_K = D_V = 64


def _sdpa_kernel(q_ref, k_ref, v_ref, ctx_ref, attn_ref, *, scale):
    """One grid step == one (batch, head, q-tile).

    q_ref   : [TQ, d_k]
    k_ref   : [Lk, d_k]   (resident across q-tiles of the same head)
    v_ref   : [Lk, d_v]   (resident across q-tiles of the same head)
    ctx_ref : [TQ, d_v]
    attn_ref: [TQ, Lk]
    """
    # Scale Q in f32 for precision, then feed the MXU bf16 (f32 accumulation).
    q = (q_ref[...].astype(jnp.float32) * scale).astype(jnp.bfloat16)
    k = k_ref[...].astype(jnp.bfloat16)

    # scores[q, k] = sum_d Q[q, d] * K[k, d]   ==   (Q @ K^T) / sqrt(d_k)
    s = jax.lax.dot_general(q, k, (((1,), (1,)), ((), ())),
                            preferred_element_type=jnp.float32)

    # Numerically-stable softmax over the key axis, all in f32.
    m = jnp.max(s, axis=-1, keepdims=True)
    p = jnp.exp(s - m)
    denom = jnp.sum(p, axis=-1, keepdims=True)
    attn = p * pl.reciprocal(denom, approx=True)          # divide on the EUP

    attn_ref[...] = attn.astype(attn_ref.dtype)

    # context = attn @ V; bf16 into the MXU, f32 accumulation.
    ctx = jnp.dot(attn.astype(jnp.bfloat16), v_ref[...].astype(jnp.bfloat16),
                  preferred_element_type=jnp.float32)
    ctx_ref[...] = ctx.astype(ctx_ref.dtype)


def _step_bytes(tq, lk, dk, dv, itemsize):
    """Rough per-grid-step VMEM footprint: double-buffered blocks + f32 temps."""
    blocks = (tq * dk + lk * dk + lk * dv + tq * dv + tq * lk) * itemsize
    temps = 4 * tq * lk * 4          # f32 scores / exp / attn temporaries
    return 2 * blocks + temps


def _choose_q_tile(lq, lk, dk, dv, itemsize, budget_bytes=10 << 20):
    """Largest q-tile (multiple of 8, divisor of Lq) fitting the VMEM budget."""
    for tq in (1024, 512, 256, 128, 64, 32, 16, 8):
        if tq <= lq and lq % tq == 0 and _step_bytes(tq, lk, dk, dv, itemsize) <= budget_bytes:
            return tq
    # Fall back to the full query length (legal: block dim == full array dim).
    return lq


def scaled_dot_product_attention(Q, K, V):
    """Pallas TPU equivalent of ScaledDotProductAttention.forward.

    Q: [B, n_heads, len_q, d_k]
    K: [B, n_heads, len_k, d_k]
    V: [B, n_heads, len_k, d_v]
    returns (context [B, n_heads, len_q, d_v], attn [B, n_heads, len_q, len_k])
    """
    B, H, Lq, dk = Q.shape
    Lk = K.shape[2]
    dv = V.shape[3]

    TQ = _choose_q_tile(Lq, Lk, dk, dv, Q.dtype.itemsize)
    grid = (B, H, Lq // TQ)

    # Explicit scoped-VMEM limit: defaults (16 MiB v5e / 32 MiB v6e,v7x) are too
    # small for larger tiles; cap at 48 MiB so it is valid on v7x (64 MiB phys).
    est = _step_bytes(TQ, Lk, dk, dv, Q.dtype.itemsize) + (4 << 20)
    vmem_limit = int(min(max(est, 32 << 20), 48 << 20))

    kern = pl.pallas_call(
        functools.partial(_sdpa_kernel, scale=1.0 / math.sqrt(D_K)),
        out_shape=(jax.ShapeDtypeStruct((B, H, Lq, dv), Q.dtype),
                   jax.ShapeDtypeStruct((B, H, Lq, Lk), Q.dtype)),
        grid=grid,
        in_specs=[
            # Q: one q-tile of one head.
            pl.BlockSpec((None, None, TQ, dk), lambda b, h, qi: (b, h, qi, 0)),
            # K / V: whole head, index_map independent of the innermost q-tile
            # axis -> block stays resident in VMEM (fetched once per head).
            pl.BlockSpec((None, None, Lk, dk), lambda b, h, qi: (b, h, 0, 0)),
            pl.BlockSpec((None, None, Lk, dv), lambda b, h, qi: (b, h, 0, 0)),
        ],
        out_specs=[
            pl.BlockSpec((None, None, TQ, dv), lambda b, h, qi: (b, h, qi, 0)),
            pl.BlockSpec((None, None, TQ, Lk), lambda b, h, qi: (b, h, qi, 0)),
        ],
        compiler_params=pltpu.CompilerParams(
            dimension_semantics=("parallel", "parallel", "parallel"),
            vmem_limit_bytes=vmem_limit),
    )
    return kern(Q, K, V)


if __name__ == "__main__":
    # Shapes implied by the module: [batch, n_heads, seq, d_k] with d_k = d_v = 64.
    B, N_HEADS, LEN_Q, LEN_K = 2, 4, 128, 128

    key = jax.random.PRNGKey(0)
    kq, kk, kv = jax.random.split(key, 3)
    Q = jax.random.normal(kq, (B, N_HEADS, LEN_Q, D_K), dtype=jnp.float32)
    K = jax.random.normal(kk, (B, N_HEADS, LEN_K, D_K), dtype=jnp.float32)
    V = jax.random.normal(kv, (B, N_HEADS, LEN_K, D_V), dtype=jnp.float32)

    context, attn = scaled_dot_product_attention(Q, K, V)
    context, attn = jax.block_until_ready((context, attn))

    assert context.shape == (B, N_HEADS, LEN_Q, D_V)
    assert attn.shape == (B, N_HEADS, LEN_Q, LEN_K)

    # Loose numerical sanity check vs. a pure-JAX reference (bf16 MXU inputs and
    # the approximate reciprocal introduce small, bounded deviations).
    scores_ref = jnp.einsum("bhqd,bhkd->bhqk", Q, K) / math.sqrt(D_K)
    attn_ref = jax.nn.softmax(scores_ref, axis=-1)
    ctx_ref = jnp.einsum("bhqk,bhkd->bhqd", attn_ref, V)
    assert float(jnp.max(jnp.abs(attn - attn_ref))) < 5e-2
    assert float(jnp.max(jnp.abs(context - ctx_ref))) < 5e-2

    print("KERNEL_OK")
</pallas_src>

<mosaic_0001>
module attributes {stable_mosaic.version = 11 : i64} {
  func.func @_sdpa_kernel(%arg0: i32, %arg1: i32, %arg2: i32, %arg3: memref<1x1x128x64xf32, #tpu.memory_space<vmem>>, %arg4: memref<1x1x128x64xf32, #tpu.memory_space<vmem>>, %arg5: memref<1x1x128x64xf32, #tpu.memory_space<vmem>>, %arg6: memref<1x1x128x64xf32, #tpu.memory_space<vmem>>, %arg7: memref<1x1x128x128xf32, #tpu.memory_space<vmem>>) attributes {dimension_semantics = [#tpu.dimension_semantics<parallel>, #tpu.dimension_semantics<parallel>, #tpu.dimension_semantics<parallel>], iteration_bounds = array<i64: 2, 4, 1>, scalar_prefetch = 0 : i64, scratch_operands = 0 : i64, tpu.core_type = #tpu.core_type<tc>, window_params = [{transform_indices = @transform_0, window_bounds = array<i64: 1, 1, 128, 64>}, {transform_indices = @transform_1, window_bounds = array<i64: 1, 1, 128, 64>}, {transform_indices = @transform_2, window_bounds = array<i64: 1, 1, 128, 64>}, {transform_indices = @transform_3, window_bounds = array<i64: 1, 1, 128, 64>}, {transform_indices = @transform_4, window_bounds = array<i64: 1, 1, 128, 128>}]} {
    %c0 = arith.constant 0 : index
    %c0_0 = arith.constant 0 : index
    %c0_1 = arith.constant 0 : index
    %c0_2 = arith.constant 0 : index
    %0 = vector.load %arg3[%c0, %c0_0, %c0_1, %c0_2] : memref<1x1x128x64xf32, #tpu.memory_space<vmem>>, vector<1x1x128x64xf32>
    %1 = vector.shape_cast %0 : vector<1x1x128x64xf32> to vector<128x64xf32>
    %cst = arith.constant 1.250000e-01 : f32
    %2 = vector.broadcast %cst : f32 to vector<128x64xf32>
    %3 = arith.mulf %1, %2 : vector<128x64xf32>
    %4 = arith.truncf %3 : vector<128x64xf32> to vector<128x64xbf16>
    %c0_3 = arith.constant 0 : index
    %c0_4 = arith.constant 0 : index
    %c0_5 = arith.constant 0 : index
    %c0_6 = arith.constant 0 : index
    %5 = vector.load %arg4[%c0_3, %c0_4, %c0_5, %c0_6] : memref<1x1x128x64xf32, #tpu.memory_space<vmem>>, vector<1x1x128x64xf32>
    %6 = vector.shape_cast %5 : vector<1x1x128x64xf32> to vector<128x64xf32>
    %7 = arith.truncf %6 : vector<128x64xf32> to vector<128x64xbf16>
    %cst_7 = arith.constant dense<0.000000e+00> : vector<128x128xf32>
    %8 = tpu.matmul %4, %7, %cst_7 {dimension_numbers = #tpu.dot_dimension_numbers<[1], [1], [0], [0], [0, 0, 1, 0], [], []>} : vector<128x64xbf16>, vector<128x64xbf16>, vector<128x128xf32> -> vector<128x128xf32>
    %cst_8 = arith.constant dense<0xFF800000> : vector<128xf32>
    %9 = vector.multi_reduction <maximumf>, %8, %cst_8 [1] : vector<128x128xf32> to vector<128xf32>
    %10 = vector.shape_cast %9 : vector<128xf32> to vector<128x1xf32>
    %11 = vector.broadcast %10 : vector<128x1xf32> to vector<128x128xf32>
    %12 = arith.subf %8, %11 : vector<128x128xf32>
    %13 = math.exp %12 : vector<128x128xf32>
    %cst_9 = arith.constant dense<0.000000e+00> : vector<128xf32>
    %14 = vector.multi_reduction <add>, %13, %cst_9 [1] : vector<128x128xf32> to vector<128xf32>
    %15 = vector.shape_cast %14 : vector<128xf32> to vector<128x1xf32>
    %16 = tpu.reciprocal %15 {approx = true} : vector<128x1xf32> -> vector<128x1xf32>
    %17 = vector.broadcast %16 : vector<128x1xf32> to vector<128x128xf32>
    %18 = arith.mulf %13, %17 : vector<128x128xf32>
    %c0_10 = arith.constant 0 : index
    %c0_11 = arith.constant 0 : index
    %c0_12 = arith.constant 0 : index
    %c0_13 = arith.constant 0 : index
    %19 = vector.load %arg7[%c0_10, %c0_11, %c0_12, %c0_13] : memref<1x1x128x128xf32, #tpu.memory_space<vmem>>, vector<1x1x128x128xf32>
    %20 = vector.shape_cast %19 : vector<1x1x128x128xf32> to vector<128x128xf32>
    %21 = vector.shape_cast %18 : vector<128x128xf32> to vector<1x1x128x128xf32>
    tpu.vector_store %arg7[%c0_10, %c0_11, %c0_12, %c0_13], %21 {strides = array<i32>} : memref<1x1x128x128xf32, #tpu.memory_space<vmem>>, vector<1x1x128x128xf32>,
    %22 = arith.truncf %18 : vector<128x128xf32> to vector<128x128xbf16>
    %c0_14 = arith.constant 0 : index
    %c0_15 = arith.constant 0 : index
    %c0_16 = arith.constant 0 : index
    %c0_17 = arith.constant 0 : index
    %23 = vector.load %arg5[%c0_14, %c0_15, %c0_16, %c0_17] : memref<1x1x128x64xf32, #tpu.memory_space<vmem>>, vector<1x1x128x64xf32>
    %24 = vector.shape_cast %23 : vector<1x1x128x64xf32> to vector<128x64xf32>
    %25 = arith.truncf %24 : vector<128x64xf32> to vector<128x64xbf16>
    %cst_18 = arith.constant dense<0.000000e+00> : vector<128x64xf32>
    %26 = tpu.matmul %22, %25, %cst_18 {dimension_numbers = #tpu.dot_dimension_numbers<[1], [0], [0], [1], [0, 0, 1, 1], [], []>} : vector<128x128xbf16>, vector<128x64xbf16>, vector<128x64xf32> -> vector<128x64xf32>
    %c0_19 = arith.constant 0 : index
    %c0_20 = arith.constant 0 : index
    %c0_21 = arith.constant 0 : index
    %c0_22 = arith.constant 0 : index
    %27 = vector.load %arg6[%c0_19, %c0_20, %c0_21, %c0_22] : memref<1x1x128x64xf32, #tpu.memory_space<vmem>>, vector<1x1x128x64xf32>
    %28 = vector.shape_cast %27 : vector<1x1x128x64xf32> to vector<128x64xf32>
    %29 = vector.shape_cast %26 : vector<128x64xf32> to vector<1x1x128x64xf32>
    tpu.vector_store %arg6[%c0_19, %c0_20, %c0_21, %c0_22], %29 {strides = array<i32>} : memref<1x1x128x64xf32, #tpu.memory_space<vmem>>, vector<1x1x128x64xf32>,
    return
  }
  func.func @transform_0(%arg0: i32, %arg1: i32, %arg2: i32) -> (i32, i32, i32, i32) {
    %c0_i32 = arith.constant 0 : i32
    %c0_i32_0 = arith.constant 0 : i32
    return %arg0, %arg1, %arg2, %c0_i32 : i32, i32, i32, i32
  }
  func.func @transform_1(%arg0: i32, %arg1: i32, %arg2: i32) -> (i32, i32, i32, i32) {
    %c0_i32 = arith.constant 0 : i32
    %c0_i32_0 = arith.constant 0 : i32
    %c0_i32_1 = arith.constant 0 : i32
    return %arg0, %arg1, %c0_i32, %c0_i32_0 : i32, i32, i32, i32
  }
  func.func @transform_2(%arg0: i32, %arg1: i32, %arg2: i32) -> (i32, i32, i32, i32) {
    %c0_i32 = arith.constant 0 : i32
    %c0_i32_0 = arith.constant 0 : i32
    %c0_i32_1 = arith.constant 0 : i32
    return %arg0, %arg1, %c0_i32, %c0_i32_0 : i32, i32, i32, i32
  }
  func.func @transform_3(%arg0: i32, %arg1: i32, %arg2: i32) -> (i32, i32, i32, i32) {
    %c0_i32 = arith.constant 0 : i32
    %c0_i32_0 = arith.constant 0 : i32
    return %arg0, %arg1, %arg2, %c0_i32 : i32, i32, i32, i32
  }
  func.func @transform_4(%arg0: i32, %arg1: i32, %arg2: i32) -> (i32, i32, i32, i32) {
    %c0_i32 = arith.constant 0 : i32
    %c0_i32_0 = arith.constant 0 : i32
    return %arg0, %arg1, %arg2, %c0_i32 : i32, i32, i32, i32
  }
}

</mosaic_0001>

<bundles_post_ra>
// kernel: tpu_custom_call.1
= control target key start
LH: loop header
LB: loop body
LE: loop exit
PB: predicated region body
PF: predicated region fallthrough
CT: control target
= control target key end

     0   :  { %10 = vsyncpa [#allocation3], 0  ;;  %s1867_s0 = inlined_call_operand.vmem [shape: f32[2,4,128,64], index: 0, kind: input, shape index: {}]   ;;  %s1868_s1 = inlined_call_operand.vmem [shape: f32[2,4,128,64], index: 1, kind: input, shape index: {}]   ;;  %s1869_s2 = inlined_call_operand.vmem [shape: f32[2,4,128,64], index: 2, kind: input, shape index: {}]   ;;  %s1870_s3 = inlined_call_operand.vmem [shape: f32[2,4,128,64], index: 3, kind: output, shape index: {0}]   ;;  %s1871_s4 = inlined_call_operand.hbm [shape: f32[2,4,128,128], index: 4, kind: output, shape index: {1}]  }
   0x1   :  { %12 = vsyncpa [#allocation3 + $0x1], 0  ;;  %s1482_s15 = smov 0   ;;  %s1484_s16 = smov 0  }
   0x2   :  { %s1486_s17 = smov 0   ;;  %s1488_s18 = smov 0  }
   0x3   :  { %s1490_s19 = smov 0   ;;  %s1492_s20 = smov 0  }
   0x4   :  { %s1494_s21 = smov 0   ;;  %s1496_s22 = smov 0  }
   0x5 LB: > { %s1087_s23 = sadd.s32 4294967295, %s1452_s22   ;;  %s1088_s24 = sadd.s32 4294967294, %s1452_s22   ;;  %s1452_s22 = sphi %s1496_s22, %s18_s22   ;;  %s1448_s21 = sphi %s1494_s21, %s1880_s21   ;;  %s1444_s20 = sphi %s1492_s20, %s1879_s20   ;;  %s1440_s19 = sphi %s1490_s19, %s1878_s19   ;;  %s1436_s18 = sphi %s1488_s18, %s1877_s18   ;;  %s1432_s17 = sphi %s1486_s17, %s1876_s17   ;;  %s1428_s16 = sphi %s1484_s16, %s1875_s16   ;;  %s1424_s15 = sphi %s1482_s15, %s1874_s15  }
   0x6   : > { %s33_s25 = sadd.s32 1, %s1444_s20  ;;  %s37_s26 = sadd.s32 1, %s1448_s21 }
   0x7   : > { %p35_p0 = scmp.ge.s32.totalorder %s33_s25, 4  ;;  %p174_p1 = scmp.ne.s32.totalorder %s1432_s17, %s1428_s16 }
   0x8   : > { %p175_p2 = scmp.eq.s32.totalorder %s1087_s23, 7  ;;  %p180_p5 = scmp.ne.s32.totalorder %s1428_s16, %s1424_s15 }
   0x9   : > { %s1882_s25 = smov (%p35_p0, %s33_s25), 0  ;;  %s1884_s26 = smov (!%p35_p0, %s37_s26), %s1448_s21 }
   0xa   : > { %s158_s27 = ssub.s32 %s1444_s20, %s1882_s25  ;;  %p1533_p3 = por %p175_p2, %p174_p1 }
   0xb   : > { %p39_p4 = scmp.ge.s32.totalorder %s1884_s26, 2  ;;  %p181_p6 = scmp.eq.s32.totalorder %s1088_s24, 7 }
   0xc   : > { %p1091_p7 = scmp.ge.s32.totalorder %s1452_s22, 1  ;;  %p240_p9 = scmp.lt.s32.totalorder %s1452_s22, 9 }
   0xd   : > { %s1886_s26 = smov (%p39_p4, %s1884_s26), 0  ;;  %p1542_p8 = por %p181_p6, %p180_p5 }
   0xe   : > { %s157_s30 = ssub.s32 %s1448_s21, %s1886_s26  ;;  %s164_s5 = sadd.s32 1, %s1432_s17 }
   0xf   : > { %s159_s6 = sor.u32 %s158_s27, %s157_s30  ;;  %p241_p10 = pnand %p1091_p7, %p240_p9 }
  0x10   : > { %p162_p11 = scmp.eq.s32.totalorder %s159_s6, 0  ;;  %p306_p12 = scmp.lt.s32.totalorder (!%p241_p10), %s1440_s19, 1 }
  0x11   : > { %244 = sbr.rel (%p241_p10) target bundleno = 837 (0x345), region = 32  ;;  %p308_p13 = scmp.lt.s32.totalorder (!%p241_p10), %s1436_s18, 3 }
  0x12   : > { %s1551_s7 = scalar_select %p162_p11, %s1432_s17, %s164_s5  }
  0x13   : > { %s1114_s14 = sshll.u32 (!%p241_p10), %s1436_s18, 4  ;;  %s1115_s23 = sshll.u32 (!%p241_p10), %s1440_s19, 6 }
  0x16   : > { %s307_s8 = scalar_select %p306_p12, %s1440_s19, 1  ;;  %vm417_vm0 = vcmask 523264  }
  0x17   : > { %s309_s9 = scalar_select %p308_p13, %s1436_s18, 3 }
  0x18   : > { %s1094_s10 = sshll.u32 %s307_s8, 6  ;;  %s1454_s18 = smov [#allocation2]  }
  0x19   : > { %s1093_s11 = sshll.u32 %s309_s9, 4  ;;  %s1364_s19 = sshll.u32 %s1454_s18, 4  ;;  %s1365_s19 = int_to_ptr.vmem [resolvable:$false] %s1364_s19 }
  0x1a   : > { %s315_s12 = sadd.s32 %s1094_s10, %s1093_s11  ;;  %s302_s10 = sand.u32 1, %s1428_s16  }
  0x1b   : > { %s1557_s13 = sshll.u32 %s315_s12, 3  ;;  %s1092_s11 = sshll.u32 %s302_s10, 7 }
  0x1c   : > { %s1563_s24 = scalar_lea.vmem %s1868_s1, %s1557_s13  ;;  %s1573_s5 = scalar_lea.vmem %s1867_s0, %s1557_s13 }
  0x1d   : > { %v407_v0 = vld [vmem:[%s1563_s24 + $0x70] sm:$0xff]  ;;  %v408_v1 = vld [vmem:[%s1563_s24 + $0x78] sm:$0xff]  ;;  %v405_v2 = vld [vmem:[%s1563_s24 + $0x60] sm:$0xff]  ;;  %s1655_s9 = scalar_lea.vmem %s1869_s2, %s1557_s13  ;;  %s1733_s12 = scalar_lea.vmem [#allocation2], %s1092_s11 }
  0x1e   : > { %v416_v3 = vpack.c.bf16 %v408_v1, %v407_v0  ;;  %v406_v4 = vld [vmem:[%s1563_s24 + $0x68] sm:$0xff]  ;;  %v353_v7 = vld [vmem:[%s1573_s5] sm:$0xff]  ;;  %v403_v9 = vld [vmem:[%s1563_s24 + $0x50] sm:$0xff]  ;;  %s903_s30 = sshll.u32 %s1733_s12, 4  ;;  %s1774_s30 = int_to_ptr.vmem [resolvable:$true] %s903_s30 }
  0x1f   : > { %v415_v5 = vpack.c.bf16 %v406_v4, %v405_v2  ;;  %v354_v8 = vld [vmem:[%s1573_s5 + $0x8] sm:$0xff]  ;;  %v404_v10 = vld [vmem:[%s1563_s24 + $0x58] sm:$0xff]  ;;  %v369_v11 = vmul.f32 0.125, %v353_v7  ;;  %v401_v16 = vld [vmem:[%s1563_s24 + $0x40] sm:$0xff]  ;;  %s1360_s11 = scalar_lea.vmem %s1774_s30, 2048  ;;  %p1367_p4 = scmp.lt.s32.totalorder %s1774_s30, %s1365_s19 }
  0x20   : > { %1215 = vmatprep.subr.msk.bf16.mxu0 %vm417_vm0, %v416_v3  ;;  %v464_v6 = vsel %vm417_vm0, %v416_v3, 0  ;;  %v370_v12 = vmul.f32 0.125, %v354_v8  ;;  %v414_v14 = vpack.c.bf16 %v404_v10, %v403_v9  ;;  %v402_v17 = vld [vmem:[%s1563_s24 + $0x48] sm:$0xff]  ;;  %v399_v20 = vld [vmem:[%s1563_s24 + $0x30] sm:$0xff]  ;;  %v400_v21 = vld [vmem:[%s1563_s24 + $0x38] sm:$0xff]  ;;  %p1361_p0 = scmp.ne.s32.totalorder %s1774_s30, %s1360_s11 }
  0x21   : > { %1152 = vmatpush3.bf16.xpose.msra.mxu0 %v464_v6  ;;  %v461_v13 = vsel %vm417_vm0, %v415_v5, 0  ;;  %v413_v19 = vpack.c.bf16 %v402_v17, %v401_v16  ;;  %v412_v23 = vpack.c.bf16 %v400_v21, %v399_v20  ;;  %v397_v24 = vld [vmem:[%s1563_s24 + $0x20] sm:$0xff]  ;;  %v398_v25 = vld [vmem:[%s1563_s24 + $0x28] sm:$0xff]  ;;  %v395_v28 = vld [vmem:[%s1563_s24 + $0x10] sm:$0xff] }
  0x22   : > { %1216 = vmatprep.subr.msk.bf16.mxu0 %vm417_vm0, %v415_v5  ;;  %v385_v15 = vpack.c.bf16 %v370_v12, %v369_v11  ;;  %v458_v18 = vsel %vm417_vm0, %v414_v14, 0  ;;  %v411_v27 = vpack.c.bf16 %v398_v25, %v397_v24  ;;  %v396_v29 = vld [vmem:[%s1563_s24 + $0x18] sm:$0xff]  ;;  %v393_v32 = vld [vmem:[%s1563_s24] sm:$0xff]  ;;  %v394_v33 = vld [vmem:[%s1563_s24 + $0x8] sm:$0xff]  ;;  %s900_s24 = sadd.s32 %s1115_s23, %s1114_s14  ;;  %p1362_p1 = pnand %p1361_p0, %p1533_p3 }
  0x23   : > { %v455_v22 = vsel %vm417_vm0, %v413_v19, 0  ;;  %v452_v26 = vsel %vm417_vm0, %v412_v23, 0  ;;  %v410_v31 = vpack.c.bf16 %v396_v29, %v395_v28  ;;  %v409_v35 = vpack.c.bf16 %v394_v33, %v393_v32  ;;  %v355_v36 = vld [vmem:[%s1573_s5 + $0x10] sm:$0xff]  ;;  %v356_v37 = vld [vmem:[%s1573_s5 + $0x18] sm:$0xff]  ;;  %v357_v39 = vld [vmem:[%s1573_s5 + $0x20] sm:$0xff]  ;;  %s1116_s27 = sshll.u32 %s900_s24, 7 }
  0x24   : > { %1167 = vmatprep.mubr.msk.bf16.mxu0 %vm417_vm0, %v385_v15  ;;  %v449_v30 = vsel %vm417_vm0, %v411_v27, 0  ;;  %v358_v40 = vld [vmem:[%s1573_s5 + $0x28] sm:$0xff]  ;;  %v371_v41 = vmul.f32 0.125, %v355_v36  ;;  %v372_v42 = vmul.f32 0.125, %v356_v37  ;;  %v373_v43 = vmul.f32 0.125, %v357_v39  ;;  %v359_v47 = vld [vmem:[%s1573_s5 + $0x30] sm:$0xff]  ;;  %s1772_s8 = scalar_lea.hbm %s1871_s4, %s1116_s27  ;;  %p1363_p2 = pneg %p1362_p1 }
  0x25   : > { %v446_v34 = vsel %vm417_vm0, %v410_v31, 0  ;;  %v443_v38 = vsel %vm417_vm0, %v409_v35, 0  ;;  %v374_v44 = vmul.f32 0.125, %v358_v40  ;;  %v360_v48 = vld [vmem:[%s1573_s5 + $0x38] sm:$0xff]  ;;  %v361_v49 = vld [vmem:[%s1573_s5 + $0x40] sm:$0xff]  ;;  %v362_v50 = vld [vmem:[%s1573_s5 + $0x48] sm:$0xff] }
  0x26   : > { %v386_v45 = vpack.c.bf16 %v372_v42, %v371_v41  ;;  %v375_v51 = vmul.f32 0.125, %v359_v47  ;;  %v376_v52 = vmul.f32 0.125, %v360_v48  ;;  %v377_v53 = vmul.f32 0.125, %v361_v49  ;;  %v363_v57 = vld [vmem:[%s1573_s5 + $0x50] sm:$0xff]  ;;  %v364_v58 = vld [vmem:[%s1573_s5 + $0x58] sm:$0xff]  ;;  %v365_v59 = vld [vmem:[%s1573_s5 + $0x60] sm:$0xff] }
  0x27   : > { %v387_v46 = vpack.c.bf16 %v374_v44, %v373_v43  ;;  %v378_v54 = vmul.f32 0.125, %v362_v50  ;;  %v366_v60 = vld [vmem:[%s1573_s5 + $0x68] sm:$0xff]  ;;  %v379_v61 = vmul.f32 0.125, %v363_v57  ;;  %v380_v62 = vmul.f32 0.125, %v364_v58  ;;  %v367_v3 = vld [vmem:[%s1573_s5 + $0x70] sm:$0xff]  ;;  %v368_v4 = vld [vmem:[%s1573_s5 + $0x78] sm:$0xff] }
  0x28   : > { %v388_v55 = vpack.c.bf16 %v376_v52, %v375_v51  ;;  %v381_v63 = vmul.f32 0.125, %v365_v59  ;;  %v382_v0 = vmul.f32 0.125, %v366_v60  ;;  %v383_v5 = vmul.f32 0.125, %v367_v3  ;;  %v745_v24 = vld [vmem:[%s1655_s9 + $0x70] sm:$0xff]  ;;  %v746_v25 = vld [vmem:[%s1655_s9 + $0x78] sm:$0xff]  ;;  %v744_v28 = vld [vmem:[%s1655_s9 + $0x68] sm:$0xff] }
  0x29   : > { %1154 = vmatpush3.bf16.xpose.msra.mxu0 %v461_v13  ;;  %v389_v56 = vpack.c.bf16 %v378_v54, %v377_v53  ;;  %v390_v1 = vpack.c.bf16 %v380_v62, %v379_v61  ;;  %v384_v6 = vmul.f32 0.125, %v368_v4 }
  0x2a   : > { %1217 = vmatprep.subr.msk.bf16.mxu0 %vm417_vm0, %v414_v14  ;;  %v391_v2 = vpack.c.bf16 %v382_v0, %v381_v63 }
  0x2b   : > { %v392_v7 = vpack.c.bf16 %v384_v6, %v383_v5 }
  0x31   : > { %1156 = vmatpush3.bf16.xpose.msra.mxu0 %v458_v18 }
  0x32   : > { %1218 = vmatprep.subr.msk.bf16.mxu0 %vm417_vm0, %v413_v19 }
  0x39   : > { %1158 = vmatpush3.bf16.xpose.msra.mxu0 %v455_v22 }
  0x3a   : > { %1219 = vmatprep.subr.msk.bf16.mxu0 %vm417_vm0, %v412_v23 }
  0x41   : > { %1160 = vmatpush3.bf16.xpose.msra.mxu0 %v452_v26  ;;  %v743_v26 = vld [vmem:[%s1655_s9 + $0x60] sm:$0xff] }
  0x42   : > { %1220 = vmatprep.subr.msk.bf16.mxu0 %vm417_vm0, %v411_v27  ;;  %v754_v27 = vpack.c.bf16 %v746_v25, %v745_v24  ;;  %v753_v29 = vpack.c.bf16 %v744_v28, %v743_v26  ;;  %v740_v25 = vld [vmem:[%s1655_s9 + $0x48] sm:$0xff] }
  0x44   : > { %1183 = vmatprep.subr.bf16.mxu1 %v754_v27 }
  0x45   : > { %1184 = vmatpush3.bf16.msra.mxu1 %v754_v27 }
  0x46   : > { %1185 = vmatprep.subr.bf16.mxu1 %v753_v29 }
  0x49   : > { %1162 = vmatpush3.bf16.xpose.msra.mxu0 %v449_v30  ;;  %1186 = vmatpush3.bf16.msra.mxu1 %v753_v29 }
  0x4a   : > { %1221 = vmatprep.subr.msk.bf16.mxu0 %vm417_vm0, %v410_v31 }
  0x51   : > { %1164 = vmatpush3.bf16.xpose.msra.mxu0 %v446_v34 }
  0x52   : > { %1222 = vmatprep.subr.msk.bf16.mxu0 %vm417_vm0, %v409_v35 }
  0x59   : > { %1166 = vmatpush3.bf16.xpose.msra.mxu0 %v443_v38 }
  0x60   : > { %1168 = vmatmul.mubr.msk.bf16.vlgmr.msra.gmra.mxu0 %vm417_vm0, %v386_v45 }
  0x61   : > { %1171 = vmatprep.mubr.msk.bf16.mxu0 %vm417_vm0, %v387_v46 }
  0x68   : > { %1172 = vmatmul.mubr.msk.bf16.gmra.mxu0 %vm417_vm0, %v388_v55 }
  0x69   : > { %1175 = vmatprep.mubr.msk.bf16.mxu0 %vm417_vm0, %v389_v56 }
  0x70   : > { %1176 = vmatmul.mubr.msk.bf16.gmra.mxu0 %vm417_vm0, %v390_v1 }
  0x71   : > { %1179 = vmatprep.mubr.msk.bf16.mxu0 %vm417_vm0, %v391_v2 }
  0x78   : > { %1180 = vmatmul.mubr.msk.bf16.gmra.mxu0 %vm417_vm0, %v392_v7 }
 0x120   : > { %v1169_v8 = vpop.f32.mrf.mxu0 }
 0x121   : > { %567 = vmax.xlane.f32.xlu1 %v1169_v8 }
 0x122   : > { %v500_v9 = vpop.f32.mrf.mxu0 }
 0x123   : > { %563 = vmax.xlane.f32.xlu0 %v500_v9 }
 0x124   : > { %v1170_v10 = vpop.f32.mrf.mxu0 }
 0x125   : > { %569 = vmax.xlane.f32.xlu1 %v1170_v10 }
 0x126   : > { %v503_v11 = vpop.f32.mrf.mxu0 }
 0x127   : > { %565 = vmax.xlane.f32.xlu0 %v503_v11 }
 0x128   : > { %v1173_v12 = vpop.f32.mrf.mxu0 }
 0x12a   : > { %v516_v13 = vpop.f32.mrf.mxu0 }
 0x12b   : > { %571 = vmax.xlane.f32.xlu0 %v516_v13 }
 0x12c   : > { %v1627_v14 = vpop.f32.mrf.mxu0 }
 0x12e   : > { %v519_v15 = vpop.f32.mrf.mxu0 }
 0x12f   : > { %575 = vmax.xlane.f32.xlu0 %v1173_v12  ;;  %573 = vmax.xlane.f32.xlu1 %v519_v15 }
 0x130   : > { %v1629_v16 = vpop.f32.mrf.mxu0 }
 0x132   : > { %v532_v17 = vpop.f32.mrf.mxu0 }
 0x133   : > { %577 = vmax.xlane.f32.xlu1 %v1627_v14  ;;  %579 = vmax.xlane.f32.xlu0 %v532_v17 }
 0x134   : > { %v1632_v18 = vpop.f32.mrf.mxu0 }
 0x136   : > { %v1634_v19 = vpop.f32.mrf.mxu0 }
 0x137   : > { %583 = vmax.xlane.f32.xlu0 %v1629_v16  ;;  %581 = vmax.xlane.f32.xlu1 %v1634_v19 }
 0x138   : > { %v1638_v20 = vpop.f32.mrf.mxu0 }
 0x13a   : > { %v1640_v21 = vpop.f32.mrf.mxu0 }
 0x13b   : > { %585 = vmax.xlane.f32.xlu1 %v1632_v18  ;;  %587 = vmax.xlane.f32.xlu0 %v1640_v21 }
 0x13c   : > { %v1644_v22 = vpop.f32.mrf.mxu0 }
 0x13e   : > { %v1646_v23 = vpop.f32.mrf.mxu0 }
 0x13f   : > { %591 = vmax.xlane.f32.xlu0 %v1638_v20  ;;  %589 = vmax.xlane.f32.xlu1 %v1646_v23 }
 0x143   : > { %593 = vmax.xlane.f32.xlu1 %v1644_v22 }
 0x1aa   : > { %v568_v30 = vpop.xlane.xlu1 %567 }
 0x1ab   : > { %v597_v31 = vsub.f32 %v1169_v8, %v568_v30  ;;  %v737_v30 = vld [vmem:[%s1655_s9 + $0x30] sm:$0xff] }
 0x1ac   : > { %v564_v32 = vpop.xlane.xlu0 %563 }
 0x1ad   : > { %v595_v33 = vsub.f32 %v500_v9, %v564_v32  ;;  %v615_v36 = vmul.f32 1.442695, %v597_v31 }
 0x1ae   : > { %v570_v34 = vpop.xlane.xlu1 %569 }
 0x1af   : > { %v611_v35 = vmul.f32 1.442695, %v595_v33  ;;  %v598_v37 = vsub.f32 %v1170_v10, %v570_v34  ;;  %v735_v34 = vld [vmem:[%s1655_s9 + $0x20] sm:$0xff] }
 0x1b0   : > { %v566_v38 = vpop.xlane.xlu0 %565 }
 0x1b1   : > { %1296 = vpow2.f32 %v611_v35  ;;  %v596_v39 = vsub.f32 %v503_v11, %v566_v38  ;;  %v617_v41 = vmul.f32 1.442695, %v598_v37  ;;  %v736_v35 = vld [vmem:[%s1655_s9 + $0x28] sm:$0xff] }
 0x1b2   : > { %1298 = vpow2.f32 %v615_v36  ;;  %v749_v37 = vpack.c.bf16 %v736_v35, %v735_v34 }
 0x1b3   : > { %v613_v40 = vmul.f32 1.442695, %v596_v39 }
 0x1b4   : > { %v572_v42 = vpop.xlane.xlu0 %571 }
 0x1b5   : > { %1300 = vpow2.f32 %v613_v40  ;;  %v599_v43 = vsub.f32 %v516_v13, %v572_v42  ;;  %v733_v40 = vld [vmem:[%s1655_s9 + $0x10] sm:$0xff] }
 0x1b6   : > { %1302 = vpow2.f32 %v617_v41  ;;  %v734_v41 = vld [vmem:[%s1655_s9 + $0x18] sm:$0xff] }
 0x1b7   : > { %v619_v44 = vmul.f32 1.442695, %v599_v43  ;;  %v748_v43 = vpack.c.bf16 %v734_v41, %v733_v40 }
 0x1b8   : > { %v576_v45 = vpop.xlane.xlu0 %575  ;;  %v574_v46 = vpop.xlane.xlu1 %573 }
 0x1b9   : > { %1304 = vpow2.f32 %v619_v44  ;;  %v601_v47 = vsub.f32 %v1173_v12, %v576_v45  ;;  %v600_v48 = vsub.f32 %v519_v15, %v574_v46  ;;  %v742_v15 = vld [vmem:[%s1655_s9 + $0x58] sm:$0xff]  ;;  %v731_v45 = vld [vmem:[%s1655_s9] sm:$0xff]  ;;  %v732_v46 = vld [vmem:[%s1655_s9 + $0x8] sm:$0xff] }
 0x1bb   : > { %v623_v49 = vmul.f32 1.442695, %v601_v47  ;;  %v621_v50 = vmul.f32 1.442695, %v600_v48  ;;  %v747_v47 = vpack.c.bf16 %v732_v46, %v731_v45 }
 0x1bc   : > { %v578_v51 = vpop.xlane.xlu1 %577  ;;  %v580_v52 = vpop.xlane.xlu0 %579 }
 0x1bd   : > { %1306 = vpow2.f32 %v623_v49  ;;  %v602_v53 = vsub.f32 %v1627_v14, %v578_v51  ;;  %v603_v54 = vsub.f32 %v532_v17, %v580_v52  ;;  %v741_v14 = vld [vmem:[%s1655_s9 + $0x50] sm:$0xff] }
 0x1be   : > { %v1662_v55 = vpop.eup %1296  ;;  %1308 = vpow2.f32 %v621_v50  ;;  %v752_v17 = vpack.c.bf16 %v742_v15, %v741_v14 }
 0x1bf   : > { %v625_v56 = vmul.f32 1.442695, %v602_v53  ;;  %v627_v57 = vmul.f32 1.442695, %v603_v54  ;;  %643 = vadd.xlane.f32.xlu0 %v1662_v55  ;;  %v1665_v60 = vpop.eup %1298 }
 0x1c0   : > { %v584_v58 = vpop.xlane.xlu0 %583  ;;  %v582_v59 = vpop.xlane.xlu1 %581  ;;  %1187 = vmatprep.subr.bf16.mxu1 %v752_v17 }
 0x1c1   : > { %1310 = vpow2.f32 %v625_v56  ;;  %v605_v61 = vsub.f32 %v1629_v16, %v584_v58  ;;  %v604_v62 = vsub.f32 %v1634_v19, %v582_v59  ;;  %1188 = vmatpush3.bf16.msra.mxu1 %v752_v17 }
 0x1c2   : > { %v1669_v63 = vpop.eup %1300  ;;  %1312 = vpow2.f32 %v627_v57 }
 0x1c3   : > { %v631_v0 = vmul.f32 1.442695, %v605_v61  ;;  %v629_v1 = vmul.f32 1.442695, %v604_v62  ;;  %647 = vadd.xlane.f32.xlu0 %v1665_v60  ;;  %645 = vadd.xlane.f32.xlu1 %v1669_v63  ;;  %v1673_v4 = vpop.eup %1302 }
 0x1c4   : > { %v586_v2 = vpop.xlane.xlu1 %585  ;;  %v588_v3 = vpop.xlane.xlu0 %587 }
 0x1c5   : > { %1314 = vpow2.f32 %v631_v0  ;;  %v606_v5 = vsub.f32 %v1632_v18, %v586_v2  ;;  %v607_v6 = vsub.f32 %v1640_v21, %v588_v3 }
 0x1c6   : > { %v1677_v7 = vpop.eup %1304  ;;  %1316 = vpow2.f32 %v629_v1 }
 0x1c7   : > { %v633_v8 = vmul.f32 1.442695, %v606_v5  ;;  %v635_v9 = vmul.f32 1.442695, %v607_v6  ;;  %651 = vadd.xlane.f32.xlu0 %v1677_v7  ;;  %649 = vadd.xlane.f32.xlu1 %v1673_v4 }
 0x1c8   : > { %v592_v10 = vpop.xlane.xlu0 %591  ;;  %v590_v11 = vpop.xlane.xlu1 %589 }
 0x1c9   : > { %1318 = vpow2.f32 %v633_v8  ;;  %v609_v12 = vsub.f32 %v1638_v20, %v592_v10  ;;  %v608_v13 = vsub.f32 %v1646_v23, %v590_v11  ;;  %v739_v23 = vld [vmem:[%s1655_s9 + $0x40] sm:$0xff] }
 0x1ca   : > { %v1685_v16 = vpop.eup %1306  ;;  %1320 = vpow2.f32 %v635_v9  ;;  %v751_v27 = vpack.c.bf16 %v740_v25, %v739_v23 }
 0x1cb   : > { %v1687_v18 = vpop.eup %1308  ;;  %v639_v19 = vmul.f32 1.442695, %v609_v12  ;;  %v637_v21 = vmul.f32 1.442695, %v608_v13  ;;  %655 = vadd.xlane.f32.xlu0 %v1685_v16 }
 0x1cc   : > { %653 = vadd.xlane.f32.xlu1 %v1687_v18  ;;  %v594_v24 = vpop.xlane.xlu1 %593  ;;  %1189 = vmatprep.subr.bf16.mxu1 %v751_v27 }
 0x1cd   : > { %1322 = vpow2.f32 %v639_v19  ;;  %v610_v20 = vsub.f32 %v1644_v22, %v594_v24  ;;  %v738_v22 = vld [vmem:[%s1655_s9 + $0x38] sm:$0xff]  ;;  %1190 = vmatpush3.bf16.msra.mxu1 %v751_v27  ;;  %s1778_s9 = scalar_lea.sflag [#allocation3], %s302_s10 }
 0x1ce   : > { %v1694_v26 = vpop.eup %1310  ;;  %1324 = vpow2.f32 %v637_v21  ;;  %v750_v32 = vpack.c.bf16 %v738_v22, %v737_v30 }
 0x1cf   : > { %v1696_v28 = vpop.eup %1312  ;;  %v641_v29 = vmul.f32 1.442695, %v610_v20 }
 0x1d0   : > { %659 = vadd.xlane.f32.xlu0 %v1696_v28  ;;  %657 = vadd.xlane.f32.xlu1 %v1694_v26 }
 0x1d1   : > { %1326 = vpow2.f32 %v641_v29  ;;  %1191 = vmatprep.subr.bf16.mxu1 %v750_v32 }
 0x1d2   : > { %v1702_v31 = vpop.eup %1314  ;;  %1192 = vmatpush3.bf16.msra.mxu1 %v750_v32 }
 0x1d3   : > { %v1704_v33 = vpop.eup %1316  ;;  %1193 = vmatprep.subr.bf16.mxu1 %v749_v37 }
 0x1d4   : > { %663 = vadd.xlane.f32.xlu0 %v1702_v31  ;;  %661 = vadd.xlane.f32.xlu1 %v1704_v33 }
 0x1d6   : > { %v1710_v36 = vpop.eup %1318  ;;  %1194 = vmatpush3.bf16.msra.mxu1 %v749_v37 }
 0x1d7   : > { %v1712_v38 = vpop.eup %1320  ;;  %1195 = vmatprep.subr.bf16.mxu1 %v748_v43 }
 0x1d8   : > { %667 = vadd.xlane.f32.xlu0 %v1712_v38  ;;  %665 = vadd.xlane.f32.xlu1 %v1710_v36 }
 0x1da   : > { %v1716_v39 = vpop.eup %1322  ;;  %1196 = vmatpush3.bf16.msra.mxu1 %v748_v43 }
 0x1db   : > { %v1720_v42 = vpop.eup %1324  ;;  %1197 = vmatprep.subr.bf16.mxu1 %v747_v47 }
 0x1dc   : > { %671 = vadd.xlane.f32.xlu0 %v1716_v39  ;;  %669 = vadd.xlane.f32.xlu1 %v1720_v42 }
 0x1de   : > { %v1724_v44 = vpop.eup %1326  ;;  %1198 = vmatpush3.bf16.msra.mxu1 %v747_v47 }
 0x1e0   : > { %673 = vadd.xlane.f32.xlu1 %v1724_v44 }
 0x248   : > { %v644_v48 = vpop.xlane.xlu0 %643 }
 0x249   : > { %1328 = vrcp.f32 %v644_v48 }
 0x24c   : > { %v648_v49 = vpop.xlane.xlu0 %647  ;;  %v646_v50 = vpop.xlane.xlu1 %645 }
 0x24d   : > { %1330 = vrcp.f32 %v648_v49 }
 0x24e   : > { %1332 = vrcp.f32 %v646_v50 }
 0x250   : > { %v652_v51 = vpop.xlane.xlu0 %651  ;;  %v650_v52 = vpop.xlane.xlu1 %649 }
 0x251   : > { %1334 = vrcp.f32 %v652_v51 }
 0x252   : > { %1336 = vrcp.f32 %v650_v52 }
 0x254   : > { %v656_v53 = vpop.xlane.xlu0 %655 }
 0x255   : > { %1338 = vrcp.f32 %v656_v53  ;;  %v654_v54 = vpop.xlane.xlu1 %653 }
 0x256   : > { %v1329_v56 = vpop.eup %1328  ;;  %1340 = vrcp.f32 %v654_v54 }
 0x257   : > { %v691_v57 = vmul.f32 %v1329_v56, %v1662_v55 }
 0x259   : > { %v660_v58 = vpop.xlane.xlu0 %659  ;;  %v658_v59 = vpop.xlane.xlu1 %657  ;;  %707 = vst [vmem:[%s1733_s12] sm:$0xff] %v691_v57 }
 0x25a   : > { %v1331_v61 = vpop.eup %1330  ;;  %1342 = vrcp.f32 %v660_v58 }
 0x25b   : > { %v1333_v62 = vpop.eup %1332  ;;  %1344 = vrcp.f32 %v658_v59  ;;  %v693_v0 = vmul.f32 %v1331_v61, %v1665_v60 }
 0x25c   : > { %v692_v1 = vmul.f32 %v1333_v62, %v1669_v63 }
 0x25d   : > { %v664_v2 = vpop.xlane.xlu0 %663  ;;  %v662_v3 = vpop.xlane.xlu1 %661  ;;  %709 = vst [vmem:[%s1733_s12 + $0x10] sm:$0xff] %v693_v0 }
 0x25e   : > { %v1335_v55 = vpop.eup %1334  ;;  %1346 = vrcp.f32 %v664_v2  ;;  %708 = vst [vmem:[%s1733_s12 + $0x8] sm:$0xff] %v692_v1  ;;  %v723_v5 = vpack.c.bf16 %v692_v1, %v691_v57 }
 0x25f   : > { %v1337_v6 = vpop.eup %1336  ;;  %1348 = vrcp.f32 %v662_v3  ;;  %v695_v8 = vmul.f32 %v1335_v55, %v1677_v7 }
 0x260   : > { %1199 = vmatprep.mubr.bf16.mxu1 %v723_v5  ;;  %v694_v9 = vmul.f32 %v1337_v6, %v1673_v4 }
 0x261   : > { %v668_v60 = vpop.xlane.xlu0 %667  ;;  %v666_v10 = vpop.xlane.xlu1 %665  ;;  %711 = vst [vmem:[%s1733_s12 + $0x20] sm:$0xff] %v695_v8 }
 0x262   : > { %v1339_v63 = vpop.eup %1338  ;;  %1350 = vrcp.f32 %v668_v60  ;;  %710 = vst [vmem:[%s1733_s12 + $0x18] sm:$0xff] %v694_v9  ;;  %v724_v11 = vpack.c.bf16 %v694_v9, %v693_v0 }
 0x263   : > { %v1341_v12 = vpop.eup %1340  ;;  %1352 = vrcp.f32 %v666_v10  ;;  %v697_v13 = vmul.f32 %v1339_v63, %v1685_v16 }
 0x264   : > { %1200 = vmatmul.mubr.bf16.vlgmr.msra.gmra.mxu1 %v724_v11  ;;  %v696_v7 = vmul.f32 %v1341_v12, %v1687_v18 }
 0x265   : > { %v672_v14 = vpop.xlane.xlu0 %671  ;;  %v670_v15 = vpop.xlane.xlu1 %669  ;;  %713 = vst [vmem:[%s1733_s12 + $0x30] sm:$0xff] %v697_v13 }
 0x266   : > { %1354 = vrcp.f32 %v672_v14  ;;  %712 = vst [vmem:[%s1733_s12 + $0x28] sm:$0xff] %v696_v7  ;;  %v725_v4 = vpack.c.bf16 %v696_v7, %v695_v8 }
 0x267   : > { %v1343_v17 = vpop.eup %1342  ;;  %1356 = vrcp.f32 %v670_v15 }
 0x268   : > { %v1345_v19 = vpop.eup %1344  ;;  %1203 = vmatprep.mubr.bf16.mxu1 %v725_v4  ;;  %v699_v21 = vmul.f32 %v1343_v17, %v1696_v28 }
 0x269   : > { %v674_v16 = vpop.xlane.xlu1 %673  ;;  %v698_v24 = vmul.f32 %v1345_v19, %v1694_v26 }
 0x26a   : > { %1358 = vrcp.f32 %v674_v16  ;;  %715 = vst [vmem:[%s1733_s12 + $0x40] sm:$0xff] %v699_v21 }
 0x26b   : > { %v1347_v18 = vpop.eup %1346  ;;  %714 = vst [vmem:[%s1733_s12 + $0x38] sm:$0xff] %v698_v24  ;;  %v726_v20 = vpack.c.bf16 %v698_v24, %v697_v13 }
 0x26c   : > { %v1349_v23 = vpop.eup %1348  ;;  %v701_v25 = vmul.f32 %v1347_v18, %v1702_v31 }
 0x26d   : > { %1204 = vmatmul.mubr.bf16.gmra.mxu1 %v726_v20  ;;  %v700_v27 = vmul.f32 %v1349_v23, %v1704_v33 }
 0x26e   : > { %717 = vst [vmem:[%s1733_s12 + $0x50] sm:$0xff] %v701_v25 }
 0x26f   : > { %v1351_v29 = vpop.eup %1350  ;;  %716 = vst [vmem:[%s1733_s12 + $0x48] sm:$0xff] %v700_v27  ;;  %v727_v28 = vpack.c.bf16 %v700_v27, %v699_v21 }
 0x270   : > { %v1353_v26 = vpop.eup %1352  ;;  %v703_v30 = vmul.f32 %v1351_v29, %v1712_v38 }
 0x271   : > { %1207 = vmatprep.mubr.bf16.mxu1 %v727_v28  ;;  %v702_v22 = vmul.f32 %v1353_v26, %v1710_v36 }
 0x272   : > { %719 = vst [vmem:[%s1733_s12 + $0x60] sm:$0xff] %v703_v30 }
 0x273   : > { %v1355_v32 = vpop.eup %1354  ;;  %718 = vst [vmem:[%s1733_s12 + $0x58] sm:$0xff] %v702_v22  ;;  %v728_v31 = vpack.c.bf16 %v702_v22, %v701_v25 }
 0x274   : > { %v1357_v33 = vpop.eup %1356  ;;  %v705_v34 = vmul.f32 %v1355_v32, %v1716_v39 }
 0x275   : > { %1208 = vmatmul.mubr.bf16.gmra.mxu1 %v728_v31  ;;  %v704_v35 = vmul.f32 %v1357_v33, %v1720_v42 }
 0x276   : > { %721 = vst [vmem:[%s1733_s12 + $0x70] sm:$0xff] %v705_v34 }
 0x277   : > { %v1359_v37 = vpop.eup %1358  ;;  %720 = vst [vmem:[%s1733_s12 + $0x68] sm:$0xff] %v704_v35  ;;  %v729_v38 = vpack.c.bf16 %v704_v35, %v703_v30 }
 0x278   : > { %v706_v36 = vmul.f32 %v1359_v37, %v1724_v44 }
 0x279   : > { %1211 = vmatprep.mubr.bf16.mxu1 %v729_v38 }
 0x27a   : > { %722 = vst [vmem:[%s1733_s12 + $0x78] sm:$0xff] %v706_v36  ;;  %v730_v40 = vpack.c.bf16 %v706_v36, %v705_v34  ;;  %s1366_s12 = scalar_lea.vmem %s1365_s19, 4096 }
 0x27b   : > { %p1368_p5 = scmp.lt.s32.totalorder %s1366_s12, %s1360_s11 }
 0x27d   : > { %1212 = vmatmul.mubr.bf16.gmra.mxu1 %v730_v40  ;;  %p1369_p6 = por %p1368_p5, %p1367_p4 }
 0x27f   : > { %p1370_p7 = pnand %p1369_p6, %p1363_p2 }
 0x281   : > { %1373 = shalt.err (!%p1370_p7)
}
 0x282   : > { %s1374_s10 = scalar_lea.hbm %s1772_s8, 2048  ;;  %s1378_s24 = scalar_lea.hbm %s1871_s4, 16384 }
 0x283   : > { %p1375_p9 = scmp.ne.s32.totalorder %s1772_s8, %s1374_s10  ;;  %p1379_p12 = scmp.lt.s32.totalorder %s1772_s8, %s1871_s4 }
 0x284   : > { %p1380_p13 = scmp.lt.s32.totalorder %s1378_s24, %s1374_s10 }
 0x285   : > { %p1376_p10 = pnand %p1375_p9, %p1533_p3 }
 0x286   : > { %p1381_p0 = por %p1380_p13, %p1379_p12 }
 0x287   : > { %p1377_p11 = pneg %p1376_p10 }
 0x289   : > { %p1382_p1 = pnand %p1381_p0, %p1377_p11 }
 0x28b   : > { %1385 = shalt.err (!%p1382_p1)
}
 0x28c   : > { %s1455_s6 = smov 128   ;;  %s1456_s11 = smov 8  }
 0x28d   : > { %1223 = dma.vmem_to_hbm [thread:$0]  (%p1533_p3), %s1774_s30, 2048, %s1772_s8, %s1778_s9, %s1455_s6, %s1455_s6, %s1456_s11  }
 0x28e   : > { %s1805_s12 = scalar_lea.vmem %s1870_s3, %s1557_s13 }
 0x324   : > { %v1201_v39 = vpop.f32.mrf.mxu1 }
 0x325   : > { %854 = vst.msk [vmem:[%s1805_s12 + $0x10] sm:$0xff] %vm417_vm0, %v1201_v39 }
 0x326   : > { %v789_v41 = vpop.f32.mrf.mxu1 }
 0x327   : > { %852 = vst.msk [vmem:[%s1805_s12] sm:$0xff] %vm417_vm0, %v789_v41 }
 0x328   : > { %v1202_v42 = vpop.f32.mrf.mxu1 }
 0x329   : > { %855 = vst.msk [vmem:[%s1805_s12 + $0x18] sm:$0xff] %vm417_vm0, %v1202_v42 }
 0x32a   : > { %v792_v43 = vpop.f32.mrf.mxu1 }
 0x32b   : > { %853 = vst.msk [vmem:[%s1805_s12 + $0x8] sm:$0xff] %vm417_vm0, %v792_v43 }
 0x32d   : > { %v1205_v44 = vpop.f32.mrf.mxu1 }
 0x32e   : > { %858 = vst.msk [vmem:[%s1805_s12 + $0x30] sm:$0xff] %vm417_vm0, %v1205_v44 }
 0x32f   : > { %v805_v45 = vpop.f32.mrf.mxu1 }
 0x330   : > { %856 = vst.msk [vmem:[%s1805_s12 + $0x20] sm:$0xff] %vm417_vm0, %v805_v45 }
 0x331   : > { %v1206_v46 = vpop.f32.mrf.mxu1 }
 0x332   : > { %859 = vst.msk [vmem:[%s1805_s12 + $0x38] sm:$0xff] %vm417_vm0, %v1206_v46 }
 0x333   : > { %v808_v47 = vpop.f32.mrf.mxu1 }
 0x334   : > { %857 = vst.msk [vmem:[%s1805_s12 + $0x28] sm:$0xff] %vm417_vm0, %v808_v47 }
 0x335   : > { %v1209_v48 = vpop.f32.mrf.mxu1 }
 0x336   : > { %862 = vst.msk [vmem:[%s1805_s12 + $0x50] sm:$0xff] %vm417_vm0, %v1209_v48 }
 0x337   : > { %v821_v49 = vpop.f32.mrf.mxu1 }
 0x338   : > { %860 = vst.msk [vmem:[%s1805_s12 + $0x40] sm:$0xff] %vm417_vm0, %v821_v49 }
 0x339   : > { %v1210_v50 = vpop.f32.mrf.mxu1 }
 0x33a   : > { %863 = vst.msk [vmem:[%s1805_s12 + $0x58] sm:$0xff] %vm417_vm0, %v1210_v50 }
 0x33b   : > { %v824_v51 = vpop.f32.mrf.mxu1 }
 0x33c   : > { %861 = vst.msk [vmem:[%s1805_s12 + $0x48] sm:$0xff] %vm417_vm0, %v824_v51 }
 0x33d   : > { %v1213_v52 = vpop.f32.mrf.mxu1 }
 0x33e   : > { %866 = vst.msk [vmem:[%s1805_s12 + $0x70] sm:$0xff] %vm417_vm0, %v1213_v52 }
 0x33f   : > { %v837_v53 = vpop.f32.mrf.mxu1 }
 0x340   : > { %864 = vst.msk [vmem:[%s1805_s12 + $0x60] sm:$0xff] %vm417_vm0, %v837_v53 }
 0x341   : > { %v1214_v54 = vpop.f32.mrf.mxu1 }
 0x342   : > { %867 = vst.msk [vmem:[%s1805_s12 + $0x78] sm:$0xff] %vm417_vm0, %v1214_v54 }
 0x343   : > { %v840_v56 = vpop.f32.mrf.mxu1 }
 0x344   : > { %865 = vst.msk [vmem:[%s1805_s12 + $0x68] sm:$0xff] %vm417_vm0, %v840_v56 }
 0x345 PF: > { %p1229_p3 = scmp.ge.s32.totalorder %s1452_s22, 2  ;;  %s934_s28 = sand.u32 1, %s1424_s15  }
 0x346   : > { %s935_s13 = scalar_lea.sflag [#allocation3], %s934_s28 }
 0x347   : > { %p1226_p2 = pnand %p1229_p3, %p1542_p8 }
 0x349   : > { %p1227_p4 = pneg %p1226_p2 }
 0x34b   : > { %1419 = dma.done.wait (%p1227_p4), %s935_s13, 2048  }
 0x34c   : > { %1421 = vsyncadd (%p1227_p4), %s935_s13, 4294965248  ;;  %s18_s22 = sadd.s32 1, %s1452_s22   ;;  %s1874_s15 = smov %s1428_s16 }
 0x34d   : > { %p15_p5 = scmp.ge.s32.totalorder %s18_s22, 10   ;;  %s1875_s16 = smov %s1432_s17 }
 0x34e   : > { %s1876_s17 = smov %s1551_s7  ;;  %s1877_s18 = smov %s1444_s20 }
 0x34f   : > { %s1878_s19 = smov %s1448_s21  ;;  %s1879_s20 = smov %s1882_s25 }
 0x350   : > { %s1880_s21 = smov %s1886_s26  ;;  %17 = sbr.rel (!%p15_p5) target bundleno = 5 (0x5), region = 85 }
 0x355   :  { %940 = vsyncpa [#allocation3], 1 }
 0x356   :  { %942 = vsyncpa [#allocation3 + $0x1], 1 }

</bundles_post_ra>
